<compile_context>
chip_gen: v7x
topology: tpu7x:2x2x1
jax: 0.10.0
libtpu: 0.0.40
codegen_flags: <defaults>
</compile_context>

<pallas_src>
import jax
import jax.numpy as jnp
from jax.experimental import pallas as pl
from jax.experimental.pallas import tpu as pltpu


def _coupling_kernel(x_ref, w1t_ref, b1_ref, w2bd_ref, b2_ref,
                     h2_ref, ssum_ref):
    """One (batch, spatial-tile) step of the affine coupling hot path.

    x_ref   : (1, 2, Ch, T)   input tile; [:,0]=h1, [:,1]=h2; spatial on lanes
    w1t_ref : (2*hid, Ch)     fused layer-1 weights (scale_net | bias_net)
    b1_ref  : (2*hid, 1)      fused layer-1 biases
    w2bd_ref: (2*Ch+1, 2*hid) block-diagonal layer-2 weights + log-det row
    b2_ref  : (2*Ch+1, 1)     layer-2 biases + log-det bias
    h2_ref  : (1, 1, Ch, T)   h2 half of the output (output aliases the input,
                              so h1 passes through with zero HBM writes)
    ssum_ref: (1, 1, T)       running per-location channel-sum of scale
                              (resident across the spatial-tile grid axis)
    """
    Ch = x_ref.shape[2]
    C = 2 * Ch

    h1 = x_ref[0, 0]                   # (Ch, T) conditioning half
    h2 = x_ref[0, 1]                   # (Ch, T) transformed half

    # Fused layer 1 of scale_net & bias_net:
    # rows [0:hid] -> scale branch, rows [hid:2*hid] -> bias branch.
    hcat = jnp.maximum(
        jnp.dot(w1t_ref[...], h1, preferred_element_type=jnp.float32)
        + b1_ref[...], 0.0)            # (2*hid, T)

    # Fused block-diagonal layer 2: rows [0:Ch] -> scale, rows [Ch:C] -> bias,
    # row C -> per-location channel-sum of scale (log-det folded into the MXU).
    sb = (jnp.dot(w2bd_ref[...], hcat, preferred_element_type=jnp.float32)
          + b2_ref[...])               # (C+1, T)
    scale = sb[:Ch]
    bias = sb[Ch:C]

    # Single dense store of the transformed half (h1 is untouched in HBM).
    h2_ref[0, 0] = (h2 - bias) * jnp.exp(-scale)

    # Accumulate the log-det partial sums across spatial tiles; the output
    # block index is constant along axis 1, so the block stays resident in
    # VMEM and only (1, T) floats are written back once per batch row.
    @pl.when(pl.program_id(1) == 0)
    def _():
        ssum_ref[...] = jnp.zeros_like(ssum_ref)
    ssum_ref[0] += sb[C:C + 1]


def _pick_tile_hw(hw, c, hidden, vmem_budget_bytes):
    """Largest lane-tile (multiple of 128 dividing hw) within a VMEM budget."""
    # Per-lane f32 bytes resident in VMEM:
    #   x tile (double-buffered) 2*C + h2 out tile (double-buffered) C
    #   + ssum 1 + hcat 2*hid + sb (C+1) + elementwise temporaries ~C
    bytes_per_lane = 4 * (5 * c + 2 * hidden + 2)
    cap = max(128, (vmem_budget_bytes // bytes_per_lane) // 128 * 128)
    if hw <= cap:
        return hw                       # full-extent block is always legal
    for t in range(cap, 127, -128):
        if hw % t == 0:
            return t
    return hw                           # no 128-multiple divisor: full extent


def affine_coupling_forward(x, params, *, vmem_budget_bytes=12 * 1024 * 1024):
    """x: NCHW float32 [B, C, H, W]. Returns (out NCHW, log_det_J [B])."""
    x = x.astype(jnp.float32)
    B, C, H, W = x.shape
    assert C % 2 == 0, "channel dim must be even for channel_split"
    Ch = C // 2
    HW = H * W
    hidden = params["ws1"].shape[1]

    # Free reshape of NCHW: halves on their own axis, spatial on the lane axis.
    x4 = x.reshape(B, 2, Ch, HW)

    # Fused layer-1 weights (scale_net | bias_net), transposed for W1^T @ h1.
    w1t = jnp.concatenate([params["ws1"], params["wb1"]], axis=1).T     # (2*hid, Ch)
    b1 = jnp.concatenate([params["bs1"], params["bb1"]], axis=1).T      # (2*hid, 1)

    # Block-diagonal fused layer-2 plus one extra row computing the channel
    # sum of scale (log-det) directly on the MXU.
    w2s = params["ws2"].T.astype(jnp.float32)                            # (Ch, hid)
    w2b = params["wb2"].T.astype(jnp.float32)                            # (Ch, hid)
    zero = jnp.zeros((Ch, hidden), jnp.float32)
    zrow = jnp.zeros((1, hidden), jnp.float32)
    logdet_row = jnp.sum(w2s, axis=0, keepdims=True)                     # (1, hid)
    w2bd = jnp.concatenate(
        [jnp.concatenate([w2s, zero], axis=1),
         jnp.concatenate([zero, w2b], axis=1),
         jnp.concatenate([logdet_row, zrow], axis=1)], axis=0)           # (C+1, 2*hid)
    b2 = jnp.concatenate(
        [params["bs2"], params["bb2"],
         jnp.sum(params["bs2"], axis=1, keepdims=True)], axis=1).T       # (C+1, 1)

    t = _pick_tile_hw(HW, C, hidden, vmem_budget_bytes)
    grid = (B, HW // t)

    full_spec = lambda arr: pl.BlockSpec(arr.shape, lambda b, j: (0, 0))

    out4, ssum = pl.pallas_call(
        _coupling_kernel,
        out_shape=(
            jax.ShapeDtypeStruct((B, 2, Ch, HW), jnp.float32),   # aliases x4
            jax.ShapeDtypeStruct((B, 1, t), jnp.float32),        # log-det partials
        ),
        grid_spec=pltpu.PrefetchScalarGridSpec(
            num_scalar_prefetch=0,
            grid=grid,
            in_specs=[
                pl.BlockSpec((1, 2, Ch, t), lambda b, j: (b, 0, 0, j)),  # x tile
                full_spec(w1t),
                full_spec(b1),
                full_spec(w2bd),
                full_spec(b2),
            ],
            out_specs=[
                # Only the h2 half is ever written; h1 passes through via the
                # aliased input buffer.
                pl.BlockSpec((1, 1, Ch, t), lambda b, j: (b, 1, 0, j)),
                # Resident accumulator block: same block index for every j.
                pl.BlockSpec((1, 1, t), lambda b, j: (b, 0, 0)),
            ],
        ),
        input_output_aliases={0: 0},
        compiler_params=pltpu.CompilerParams(
            dimension_semantics=("parallel", "arbitrary"),
            vmem_limit_bytes=32 * 1024 * 1024),
    )(x4, w1t, b1, w2bd, b2)

    out = out4.reshape(B, C, H, W)                 # free reshape back to NCHW
    log_det = -jnp.sum(ssum[:, 0, :], axis=1)      # finish lane reduction
    return out, log_det


def _reference_forward(x, params):
    """Pure-JAX reference matching the PyTorch affine branch."""
    B, C, H, W = x.shape
    Ch = C // 2
    h1, h2 = x[:, :Ch], x[:, Ch:]
    h1f = jnp.transpose(h1, (0, 2, 3, 1)).reshape(-1, Ch)

    def net(w1, b1, w2, b2):
        h = jnp.maximum(h1f @ w1 + b1, 0.0)
        return h @ w2 + b2

    scale_f = net(params["ws1"], params["bs1"], params["ws2"], params["bs2"])
    bias_f = net(params["wb1"], params["bb1"], params["wb2"], params["bb2"])
    scale = jnp.transpose(scale_f.reshape(B, H, W, Ch), (0, 3, 1, 2))
    bias = jnp.transpose(bias_f.reshape(B, H, W, Ch), (0, 3, 1, 2))
    h2n = (h2 - bias) * jnp.exp(-scale)
    out = jnp.concatenate([h1, h2n], axis=1)
    log_det = -scale.reshape(B, -1).sum(axis=1)
    return out, log_det


if __name__ == "__main__":
    key = jax.random.PRNGKey(0)
    B, C, H, W = 2, 4, 16, 16
    Ch, hidden = C // 2, 32

    keys = jax.random.split(key, 9)
    x = jax.random.normal(keys[0], (B, C, H, W), dtype=jnp.float32)

    def w(k, shape, scale=0.1):
        return (scale * jax.random.normal(k, shape)).astype(jnp.float32)

    params = {
        # scale_net (pointwise 2-layer MLP)
        "ws1": w(keys[1], (Ch, hidden)),
        "bs1": w(keys[2], (1, hidden)),
        "ws2": w(keys[3], (hidden, Ch)),
        "bs2": w(keys[4], (1, Ch)),
        # bias_net
        "wb1": w(keys[5], (Ch, hidden)),
        "bb1": w(keys[6], (1, hidden)),
        "wb2": w(keys[7], (hidden, Ch)),
        "bb2": w(keys[8], (1, Ch)),
    }

    # Reference first (x is not donated, so the aliased kernel cannot clobber it).
    out_ref, log_det_ref = _reference_forward(x, params)

    fwd = jax.jit(affine_coupling_forward)
    out, log_det = fwd(x, params)
    out = jax.block_until_ready(out)
    log_det = jax.block_until_ready(log_det)

    assert jnp.allclose(out, out_ref, atol=1e-5, rtol=1e-5), "output mismatch"
    assert jnp.allclose(log_det, log_det_ref, atol=1e-4, rtol=1e-5), "log_det mismatch"

    # TODO(synk): only the 'affine' coupling forward (identity clamp) is
    # implemented; 'additive'/'affineEx' branches and inverse() are not.
    print("KERNEL_OK")
</pallas_src>

<mosaic_0001>
module attributes {stable_mosaic.version = 11 : i64} {
  func.func @_coupling_kernel(%arg0: i32, %arg1: i32, %arg2: memref<1x2x2x256xf32, #tpu.memory_space<vmem>>, %arg3: memref<64x2xf32, #tpu.memory_space<vmem>>, %arg4: memref<64x1xf32, #tpu.memory_space<vmem>>, %arg5: memref<5x64xf32, #tpu.memory_space<vmem>>, %arg6: memref<5x1xf32, #tpu.memory_space<vmem>>, %arg7: memref<1x1x2x256xf32, #tpu.memory_space<vmem>>, %arg8: memref<1x1x256xf32, #tpu.memory_space<vmem>>) attributes {dimension_semantics = [#tpu.dimension_semantics<parallel>, #tpu.dimension_semantics<arbitrary>], iteration_bounds = array<i64: 2, 1>, scalar_prefetch = 0 : i64, scratch_operands = 0 : i64, tpu.core_type = #tpu.core_type<tc>, window_params = [{transform_indices = @transform_0, window_bounds = array<i64: 1, 2, 2, 256>}, {pipeline_mode = #tpu.pipeline_mode<synchronous>, transform_indices = @transform_1, window_bounds = array<i64: 64, 2>}, {pipeline_mode = #tpu.pipeline_mode<synchronous>, transform_indices = @transform_2, window_bounds = array<i64: 64, 1>}, {pipeline_mode = #tpu.pipeline_mode<synchronous>, transform_indices = @transform_3, window_bounds = array<i64: 5, 64>}, {pipeline_mode = #tpu.pipeline_mode<synchronous>, transform_indices = @transform_4, window_bounds = array<i64: 5, 1>}, {transform_indices = @transform_5, window_bounds = array<i64: 1, 1, 2, 256>}, {transform_indices = @transform_6, window_bounds = array<i64: 1, 1, 256>}]} {
    %c0 = arith.constant 0 : index
    %c0_0 = arith.constant 0 : index
    %c0_1 = arith.constant 0 : index
    %c0_2 = arith.constant 0 : index
    %0 = vector.load %arg2[%c0, %c0_0, %c0_1, %c0_2] : memref<1x2x2x256xf32, #tpu.memory_space<vmem>>, vector<1x1x2x256xf32>
    %1 = vector.shape_cast %0 : vector<1x1x2x256xf32> to vector<2x256xf32>
    %c0_3 = arith.constant 0 : index
    %c1 = arith.constant 1 : index
    %c0_4 = arith.constant 0 : index
    %c0_5 = arith.constant 0 : index
    %2 = vector.load %arg2[%c0_3, %c1, %c0_4, %c0_5] : memref<1x2x2x256xf32, #tpu.memory_space<vmem>>, vector<1x1x2x256xf32>
    %3 = vector.shape_cast %2 : vector<1x1x2x256xf32> to vector<2x256xf32>
    %c0_6 = arith.constant 0 : index
    %c0_7 = arith.constant 0 : index
    %4 = vector.load %arg3[%c0_6, %c0_7] : memref<64x2xf32, #tpu.memory_space<vmem>>, vector<64x2xf32>
    %cst = arith.constant dense<0.000000e+00> : vector<64x256xf32>
    %5 = tpu.matmul %4, %1, %cst {dimension_numbers = #tpu.dot_dimension_numbers<[1], [0], [0], [1], [0, 0, 1, 1], [], []>} : vector<64x2xf32>, vector<2x256xf32>, vector<64x256xf32> -> vector<64x256xf32>
    %c0_8 = arith.constant 0 : index
    %c0_9 = arith.constant 0 : index
    %6 = vector.load %arg4[%c0_8, %c0_9] : memref<64x1xf32, #tpu.memory_space<vmem>>, vector<64x1xf32>
    %7 = vector.broadcast %6 : vector<64x1xf32> to vector<64x256xf32>
    %8 = arith.addf %5, %7 : vector<64x256xf32>
    %cst_10 = arith.constant 0.000000e+00 : f32
    %9 = vector.broadcast %cst_10 : f32 to vector<64x256xf32>
    %10 = arith.maximumf %8, %9 : vector<64x256xf32>
    %c0_11 = arith.constant 0 : index
    %c0_12 = arith.constant 0 : index
    %11 = vector.load %arg5[%c0_11, %c0_12] : memref<5x64xf32, #tpu.memory_space<vmem>>, vector<5x64xf32>
    %cst_13 = arith.constant dense<0.000000e+00> : vector<5x256xf32>
    %12 = tpu.matmul %11, %10, %cst_13 {dimension_numbers = #tpu.dot_dimension_numbers<[1], [0], [0], [1], [0, 0, 1, 1], [], []>} : vector<5x64xf32>, vector<64x256xf32>, vector<5x256xf32> -> vector<5x256xf32>
    %c0_14 = arith.constant 0 : index
    %c0_15 = arith.constant 0 : index
    %13 = vector.load %arg6[%c0_14, %c0_15] : memref<5x1xf32, #tpu.memory_space<vmem>>, vector<5x1xf32>
    %14 = vector.broadcast %13 : vector<5x1xf32> to vector<5x256xf32>
    %15 = arith.addf %12, %14 : vector<5x256xf32>
    %16 = vector.extract_strided_slice %15 {offsets = [0, 0], sizes = [2, 256], strides = [1, 1]} : vector<5x256xf32> to vector<2x256xf32>
    %17 = vector.extract_strided_slice %15 {offsets = [2, 0], sizes = [2, 256], strides = [1, 1]} : vector<5x256xf32> to vector<2x256xf32>
    %18 = arith.subf %3, %17 : vector<2x256xf32>
    %cst_16 = arith.constant 0.000000e+00 : f32
    %19 = vector.broadcast %cst_16 : f32 to vector<2x256xf32>
    %20 = arith.subf %19, %16 : vector<2x256xf32>
    %21 = math.exp %20 : vector<2x256xf32>
    %22 = arith.mulf %18, %21 : vector<2x256xf32>
    %c0_17 = arith.constant 0 : index
    %c0_18 = arith.constant 0 : index
    %c0_19 = arith.constant 0 : index
    %c0_20 = arith.constant 0 : index
    %23 = vector.load %arg7[%c0_17, %c0_18, %c0_19, %c0_20] : memref<1x1x2x256xf32, #tpu.memory_space<vmem>>, vector<1x1x2x256xf32>
    %24 = vector.shape_cast %23 : vector<1x1x2x256xf32> to vector<2x256xf32>
    %25 = vector.shape_cast %22 : vector<2x256xf32> to vector<1x1x2x256xf32>
    tpu.vector_store %arg7[%c0_17, %c0_18, %c0_19, %c0_20], %25 {strides = array<i32>} : memref<1x1x2x256xf32, #tpu.memory_space<vmem>>, vector<1x1x2x256xf32>,
    %c0_i32 = arith.constant 0 : i32
    %26 = arith.cmpi eq, %arg1, %c0_i32 : i32
    %27 = arith.extui %26 : i1 to i32
    %c0_i32_21 = arith.constant 0 : i32
    %28 = arith.cmpi ne, %27, %c0_i32_21 : i32
    scf.if %28 {
      %cst_28 = arith.constant 0.000000e+00 : f32
      %36 = vector.broadcast %cst_28 : f32 to vector<1x1x256xf32>
      %c0_29 = arith.constant 0 : index
      %c0_30 = arith.constant 0 : index
      %c0_31 = arith.constant 0 : index
      %37 = vector.load %arg8[%c0_29, %c0_30, %c0_31] : memref<1x1x256xf32, #tpu.memory_space<vmem>>, vector<1x1x256xf32>
      tpu.vector_store %arg8[%c0_29, %c0_30, %c0_31], %36 {strides = array<i32>} : memref<1x1x256xf32, #tpu.memory_space<vmem>>, vector<1x1x256xf32>,
    } else {
    }
    %c0_22 = arith.constant 0 : index
    %c0_23 = arith.constant 0 : index
    %c0_24 = arith.constant 0 : index
    %29 = vector.load %arg8[%c0_22, %c0_23, %c0_24] : memref<1x1x256xf32, #tpu.memory_space<vmem>>, vector<1x1x256xf32>
    %30 = vector.shape_cast %29 : vector<1x1x256xf32> to vector<1x256xf32>
    %31 = vector.extract_strided_slice %15 {offsets = [4, 0], sizes = [1, 256], strides = [1, 1]} : vector<5x256xf32> to vector<1x256xf32>
    %32 = arith.addf %30, %31 : vector<1x256xf32>
    %c0_25 = arith.constant 0 : index
    %c0_26 = arith.constant 0 : index
    %c0_27 = arith.constant 0 : index
    %33 = vector.load %arg8[%c0_25, %c0_26, %c0_27] : memref<1x1x256xf32, #tpu.memory_space<vmem>>, vector<1x1x256xf32>
    %34 = vector.shape_cast %33 : vector<1x1x256xf32> to vector<1x256xf32>
    %35 = vector.shape_cast %32 : vector<1x256xf32> to vector<1x1x256xf32>
    tpu.vector_store %arg8[%c0_25, %c0_26, %c0_27], %35 {strides = array<i32>} : memref<1x1x256xf32, #tpu.memory_space<vmem>>, vector<1x1x256xf32>,
    return
  }
  func.func @transform_0(%arg0: i32, %arg1: i32) -> (i32, i32, i32, i32) {
    %c0_i32 = arith.constant 0 : i32
    %c0_i32_0 = arith.constant 0 : i32
    %c0_i32_1 = arith.constant 0 : i32
    return %arg0, %c0_i32, %c0_i32_0, %arg1 : i32, i32, i32, i32
  }
  func.func @transform_1(%arg0: i32, %arg1: i32) -> (i32, i32) {
    %c0_i32 = arith.constant 0 : i32
    %c0_i32_0 = arith.constant 0 : i32
    %c0_i32_1 = arith.constant 0 : i32
    return %c0_i32, %c0_i32_0 : i32, i32
  }
  func.func @transform_2(%arg0: i32, %arg1: i32) -> (i32, i32) {
    %c0_i32 = arith.constant 0 : i32
    %c0_i32_0 = arith.constant 0 : i32
    %c0_i32_1 = arith.constant 0 : i32
    return %c0_i32, %c0_i32_0 : i32, i32
  }
  func.func @transform_3(%arg0: i32, %arg1: i32) -> (i32, i32) {
    %c0_i32 = arith.constant 0 : i32
    %c0_i32_0 = arith.constant 0 : i32
    %c0_i32_1 = arith.constant 0 : i32
    return %c0_i32, %c0_i32_0 : i32, i32
  }
  func.func @transform_4(%arg0: i32, %arg1: i32) -> (i32, i32) {
    %c0_i32 = arith.constant 0 : i32
    %c0_i32_0 = arith.constant 0 : i32
    %c0_i32_1 = arith.constant 0 : i32
    return %c0_i32, %c0_i32_0 : i32, i32
  }
  func.func @transform_5(%arg0: i32, %arg1: i32) -> (i32, i32, i32, i32) {
    %c1_i32 = arith.constant 1 : i32
    %c0_i32 = arith.constant 0 : i32
    %c0_i32_0 = arith.constant 0 : i32
    return %arg0, %c1_i32, %c0_i32, %arg1 : i32, i32, i32, i32
  }
  func.func @transform_6(%arg0: i32, %arg1: i32) -> (i32, i32, i32) {
    %c0_i32 = arith.constant 0 : i32
    %c0_i32_0 = arith.constant 0 : i32
    %c0_i32_1 = arith.constant 0 : i32
    return %arg0, %c0_i32, %c0_i32_0 : i32, i32, i32
  }
}

</mosaic_0001>

<bundles_post_ra>
// kernel: neg.1
= control target key start
LH: loop header
LB: loop body
LE: loop exit
PB: predicated region body
PF: predicated region fallthrough
CT: control target
= control target key end

     0   :  { %2 = vsyncpa [#allocation1], 0  ;;  %s70_s0 = inlined_call_operand.vmem [shape: f32[2], index: 0, kind: input, shape index: {}]   ;;  %s71_s1 = inlined_call_operand.hbm [shape: f32[2], index: 1, kind: output, shape index: {}]  }
   0x1   :  { %v3_v0 = vld [vmem:[%s70_s0] sm:$0x1]  ;;  %s44_s0 = smov [#allocation0]  }
   0x2   :  { %v6_v1 = vxor.u32 2147483648, %v3_v0  ;;  %s13_s8 = sshll.u32 %s44_s0, 4  ;;  %s14_s8 = int_to_ptr.vmem [resolvable:$true] %s13_s8 }
   0x3   :  { %s20_s9 = scalar_lea.vmem %s14_s8, 16  ;;  %s24_s10 = scalar_lea.vmem %s14_s8, 32 }
   0x4   :  { %8 = vst [vmem:[#allocation0] sm:$0x1] %v6_v1  ;;  %p21_p0 = scmp.ne.s32.totalorder %s14_s8, %s20_s9  ;;  %p25_p1 = scmp.lt.s32.totalorder %s14_s8, %s14_s8 }
   0x5   :  { %p26_p2 = scmp.lt.s32.totalorder %s24_s10, %s20_s9 }
   0x7   :  { %p27_p3 = por %p26_p2, %p25_p1 }
   0x9   :  { %p28_p4 = pnand %p27_p3, %p21_p0 }
   0xb   :  { %31 = shalt.err (!%p28_p4)
}
   0xc   :  { %s32_s13 = scalar_lea.hbm %s71_s1, 16 }
   0xd   :  { %p33_p5 = scmp.ne.s32.totalorder %s71_s1, %s32_s13  ;;  %p36_p6 = scmp.lt.u32.totalorder %s32_s13, %s71_s1 }
   0xf   :  { %p38_p7 = pnand %p36_p6, %p33_p5 }
  0x11   :  { %41 = shalt.err (!%p38_p7)
}
  0x12   :  { %16 = dma.vmem_to_hbm [thread:$0]  %s14_s8, 16, %s71_s1, [#allocation1]  }
  0x13   :  { %42 = dma.done.wait [#allocation1], 16  }
  0x14   :  { %43 = vsyncadd [#allocation1], 4294967280 }
  0x15   :  { %18 = vsyncpa [#allocation1], 1 }

// kernel: affine_coupling_forward.1
= control target key start
LH: loop header
LB: loop body
LE: loop exit
PB: predicated region body
PF: predicated region fallthrough
CT: control target
= control target key end

     0   :  { %s942_s21 = smov 0   ;;  %s944_s22 = smov 0   ;;  %s1067_s0 = inlined_call_operand.vmem [shape: f32[2,2,2,256], index: 0, kind: input, shape index: {}, may-alias: {0,5}]   ;;  %s1068_s1 = inlined_call_operand.vmem [shape: f32[64,2], index: 1, kind: input, shape index: {}]   ;;  %s1069_s2 = inlined_call_operand.vmem [shape: f32[64,1], index: 2, kind: input, shape index: {}]   ;;  %s1070_s3 = inlined_call_operand.vmem [shape: f32[5,64], index: 3, kind: input, shape index: {}]   ;;  %s1071_s4 = inlined_call_operand.vmem [shape: f32[5,1], index: 4, kind: input, shape index: {}]   ;;  %s1072_s5 = inlined_call_operand.vmem [shape: f32[2,2,2,256], index: 5, kind: output, shape index: {0}, may-alias: {0,5}]   ;;  %s1073_s6 = inlined_call_operand.vmem [shape: f32[2,1,256], index: 6, kind: output, shape index: {1}]  }
   0x1   :  { %s946_s23 = smov 0  }
   0x2 LB: > { %s29_s24 = sadd.s32 1, %s897_s22  ;;  %p805_p0 = scmp.ge.s32.totalorder %s901_s23, 1  ;;  %s901_s23 = sphi %s946_s23, %s17_s23   ;;  %s897_s22 = sphi %s944_s22, %s1077_s22   ;;  %s893_s21 = sphi %s942_s21, %s1076_s21  }
   0x3   : > { %p31_p1 = scmp.ge.s32.totalorder %s29_s24, 2  ;;  %p236_p2 = scmp.lt.s32.totalorder %s901_s23, 3 }
   0x5   : > { %s1079_s24 = smov (%p31_p1, %s29_s24), 0  ;;  %p237_p3 = pnand %p805_p0, %p236_p2 }
   0x6   : > { %p280_p4 = scmp.lt.s32.totalorder (!%p237_p3), %s893_s21, 1  ;;  %v619_v0 = vlaneseq (!%p237_p3)  ;;  %v903_v1 = vmov (!%p237_p3), 0.0   ;;  %v904_v2 = vmov (!%p237_p3), 0   ;;  %v315_v3 = vld [vmem:[%s1069_s2] sm:$0xff] (!%p237_p3)  ;;  %v317_v4 = vld [vmem:[%s1069_s2 + $0x10] sm:$0xff] (!%p237_p3)  ;;  %v316_v6 = vld [vmem:[%s1069_s2 + $0x8] sm:$0xff] (!%p237_p3) }
   0x7   : > { %240 = sbr.rel (%p237_p3) target bundleno = 510 (0x1fe), region = 40  ;;  %466 = vmatprep.mubr.f32.mxu0 (!%p237_p3), %v903_v1  ;;  %606 = vmatprep.mubr.f32.mxu1 (!%p237_p3), %v903_v1  ;;  %v318_v7 = vld [vmem:[%s1069_s2 + $0x18] sm:$0xff] (!%p237_p3)  ;;  %vm397_vm1 = vcmask (!%p237_p3), 1041408   ;;  %v307_v10 = vld [vmem:[%s1068_s1] sm:$0xff] (!%p237_p3)  ;;  %vm372_vm2 = vcmask (!%p237_p3), 15360   ;;  %v320_v12 = vld [vmem:[%s1069_s2 + $0x28] sm:$0xff] (!%p237_p3) }
   0x8   : > { %873 = vset.pattern.permute.xlu0 (!%p237_p3), %v904_v2  ;;  %874 = vset.pattern.permute.xlu1 (!%p237_p3), %v904_v2  ;;  %vm971_vm0 = vcmp.lt.s32.totalorder (!%p237_p3), %v619_v0, 256  ;;  %v319_v11 = vld [vmem:[%s1069_s2 + $0x20] sm:$0xff] (!%p237_p3)  ;;  %v308_v13 = vld [vmem:[%s1068_s1 + $0x8] sm:$0xff] (!%p237_p3)  ;;  %v321_v14 = vld [vmem:[%s1069_s2 + $0x30] sm:$0xff] (!%p237_p3)  ;;  %vm538_vm3 = vcmask (!%p237_p3), 523264  }
   0x9   : > { %325 = vperm.xlu0 (!%p237_p3), %873, %v315_v3   ;;  %335 = vperm.xlu1 (!%p237_p3), %874, %v317_v4   ;;  %v322_v15 = vld [vmem:[%s1069_s2 + $0x38] sm:$0xff] (!%p237_p3)  ;;  %v309_v16 = vld [vmem:[%s1068_s1 + $0x10] sm:$0xff] (!%p237_p3)  ;;  %v532_v17 = vld [vmem:[%s1071_s4] sm:$0x1f] (!%p237_p3) }
   0xa   : > { %v310_v18 = vld [vmem:[%s1068_s1 + $0x18] sm:$0xff] (!%p237_p3)  ;;  %v311_v19 = vld [vmem:[%s1068_s1 + $0x20] sm:$0xff] (!%p237_p3)  ;;  %v312_v20 = vld [vmem:[%s1068_s1 + $0x28] sm:$0xff] (!%p237_p3) }
   0xb   : > { %v313_v21 = vld [vmem:[%s1068_s1 + $0x30] sm:$0xff] (!%p237_p3)  ;;  %v314_v22 = vld [vmem:[%s1068_s1 + $0x38] sm:$0xff] (!%p237_p3) }
   0xd   : > { %330 = vperm.xlu0 (!%p237_p3), %873, %v316_v6   ;;  %340 = vperm.xlu1 (!%p237_p3), %874, %v318_v7  }
   0xe   : > { %s1081_s21 = smov (!%p280_p4, %s893_s21), 1 }
   0xf   : > { %s827_s29 = sshll.u32 %s1081_s21, 3  ;;  %s810_s30 = sshll.u32 %s1081_s21, 1 }
  0x10   : > { %s980_s9 = scalar_lea.vmem %s1067_s0, %s827_s29  ;;  %s991_s16 = scalar_lea.vmem %s1073_s6, %s810_s30 }
  0x11   : > { %v812_v8 = vld.sshfl [vmem:[%s980_s9] sm:$0x33 pattern:$0x76325410]  ;;  %653 = vst.msk [vmem:[%s991_s16] sm:$0x3] %vm971_vm0, %v903_v1  ;;  %345 = vperm.xlu0 %873, %v319_v11   ;;  %350 = vperm.xlu1 %874, %v320_v12   ;;  %s745_s12 = scalar_lea.vmem %s1072_s5, %s827_s29 }
  0x12   : > { %v371_v9 = vcombine.high %v812_v8, %v812_v8 }
  0x14   : > { %813 = vmatprep.subr.msk.mxu0 %vm397_vm1, %v371_v9 }
  0x15   : > { %814 = vmatpush1.msk.msra.mxu0 %vm397_vm1, %v812_v8  ;;  %355 = vperm.xlu0 %873, %v321_v14  }
  0x16   : > { %815 = vmatmul.mubr.msk.f32.vlgmr.msra.gmra.mrb[0].mxu0 %vm372_vm2, %v307_v10  ;;  %360 = vperm.xlu1 %874, %v322_v15  }
  0x17   : > { %472 = vmatprep.mubr.f32.mxu0 %v903_v1 }
  0x19   : > { %535 = vperm.xlu0 %873, %v532_v17  }
  0x1a   : > { %816 = vmatmul.mubr.msk.f32.gmra.mrb[2].mxu0 %vm372_vm2, %v308_v13 }
  0x1b   : > { %478 = vmatprep.mubr.f32.mxu0 %v903_v1 }
  0x1e   : > { %817 = vmatmul.mubr.msk.f32.gmra.mrb[4].mxu0 %vm372_vm2, %v309_v16 }
  0x1f   : > { %484 = vmatprep.mubr.f32.mxu0 %v903_v1 }
  0x22   : > { %818 = vmatmul.mubr.msk.f32.gmra.mrb[6].mxu0 %vm372_vm2, %v310_v18 }
  0x23   : > { %490 = vmatprep.mubr.f32.mxu0 %v903_v1 }
  0x26   : > { %819 = vmatmul.mubr.msk.f32.gmra.mrb[8].mxu0 %vm372_vm2, %v311_v19 }
  0x27   : > { %496 = vmatprep.mubr.f32.mxu0 %v903_v1 }
  0x2a   : > { %820 = vmatmul.mubr.msk.f32.gmra.mrb[10].mxu0 %vm372_vm2, %v312_v20 }
  0x2b   : > { %502 = vmatprep.mubr.f32.mxu0 %v903_v1 }
  0x2e   : > { %821 = vmatmul.mubr.msk.f32.gmra.mrb[12].mxu0 %vm372_vm2, %v313_v21 }
  0x2f   : > { %508 = vmatprep.mubr.f32.mxu0 %v903_v1 }
  0x32   : > { %822 = vmatmul.mubr.msk.f32.gmra.mrb[14].mxu0 %vm372_vm2, %v314_v22 }
  0x88   : > { %v326_v23 = vpop.permute.xlu0 %325  ;;  %v336_v32 = vpop.permute.xlu1 %335 }
  0x8c   : > { %v331_v27 = vpop.permute.xlu0 %330  ;;  %v341_v43 = vpop.permute.xlu1 %340 }
  0x90   : > { %v346_v56 = vpop.permute.xlu0 %345  ;;  %v351_v59 = vpop.permute.xlu1 %350 }
  0x94   : > { %v356_v10 = vpop.permute.xlu0 %355 }
  0x95   : > { %v361_v13 = vpop.permute.xlu1 %360 }
  0xe9   : > { %v468_v24 = vpop.f32.mrb[0].mxu0 }
  0xea   : > { %v470_v25 = vpop.f32.mrb[1].mxu0  ;;  %v469_v26 = vadd.f32 %v468_v24, %v326_v23 }
  0xeb   : > { %v471_v28 = vadd.f32 %v470_v25, %v326_v23  ;;  %v531_v25 = vld [vmem:[%s1070_s3] sm:$0x1f] }
  0xec   : > { %v515_v34 = vmax.f32 %v469_v26, 0.0  ;;  %v905_v26 = vmov 1983009808  }
  0xed   : > { %v474_v29 = vpop.f32.mrb[2].mxu0  ;;  %v516_v36 = vmax.f32 %v471_v28, 0.0  ;;  %v906_v28 = vmov 1966171168  }
  0xee   : > { %v475_v30 = vadd.f32 %v474_v29, %v331_v27  ;;  %v476_v31 = vpop.f32.mrb[3].mxu0  ;;  %v657_v29 = vunpack.c.l.s4 %v906_v28 }
  0xef   : > { %v477_v33 = vadd.f32 %v476_v31, %v331_v27  ;;  %v617_v27 = vunpack.c.l.s4 %v905_v26  ;;  %v620_v31 = vshrl.u32 %v619_v0, 7 }
  0xf0   : > { %v517_v35 = vmax.f32 %v475_v30, 0.0 }
  0xf1   : > { %v518_v37 = vmax.f32 %v477_v33, 0.0  ;;  %v480_v38 = vpop.f32.mrb[4].mxu0  ;;  %v618_v30 = vunpack.c.0.s8 %v617_v27  ;;  %v536_v33 = vpop.permute.xlu0 %535 }
  0xf2   : > { %v482_v39 = vpop.f32.mrb[5].mxu0  ;;  %v831_v40 = vpack.c.bf16 %v517_v35, %v515_v34  ;;  %v481_v42 = vadd.f32 %v480_v38, %v336_v32 }
  0xf3   : > { %v829_v41 = vpack.c.bf16 %v518_v37, %v516_v36  ;;  %v483_v44 = vadd.f32 %v482_v39, %v336_v32  ;;  %v658_v32 = vunpack.c.0.s8 %v657_v29  ;;  %v621_v38 = vsub.s32 %v618_v30, %v620_v31 }
  0xf4   : > { %v519_v49 = vmax.f32 %v481_v42, 0.0 }
  0xf5   : > { %v486_v45 = vpop.f32.mrb[6].mxu0  ;;  %830 = vmatprep.subr.bf16.mxu1 %v829_v41  ;;  %v520_v51 = vmax.f32 %v483_v44, 0.0  ;;  %v661_v39 = vsub.s32 %v658_v32, %v620_v31 }
  0xf6   : > { %v487_v46 = vadd.f32 %v486_v45, %v341_v43  ;;  %v488_v47 = vpop.f32.mrb[7].mxu0  ;;  %832 = vmatpush1.bf16.msra.mxu1 %v831_v40 }
  0xf7   : > { %v489_v48 = vadd.f32 %v488_v47, %v341_v43  ;;  %v811_v47 = vld [vmem:[%s980_s9 + $0x4] sm:$0xf] }
  0xf8   : > { %v521_v50 = vmax.f32 %v487_v46, 0.0 }
  0xf9   : > { %v522_v52 = vmax.f32 %v489_v48, 0.0  ;;  %v492_v53 = vpop.f32.mrb[8].mxu0  ;;  %v654_v48 = vld [vmem:[%s991_s16] sm:$0x3] }
  0xfa   : > { %v835_v54 = vpack.c.bf16 %v521_v50, %v519_v49  ;;  %v494_v55 = vpop.f32.mrb[9].mxu0  ;;  %v493_v58 = vadd.f32 %v492_v53, %v346_v56 }
  0xfb   : > { %v833_v57 = vpack.c.bf16 %v522_v52, %v520_v51  ;;  %v495_v60 = vadd.f32 %v494_v55, %v346_v56 }
  0xfc   : > { %v523_v2 = vmax.f32 %v493_v58, 0.0 }
  0xfd   : > { %v498_v61 = vpop.f32.mrb[10].mxu0  ;;  %834 = vmatprep.subr.bf16.mxu1 %v833_v57  ;;  %v524_v4 = vmax.f32 %v495_v60, 0.0 }
  0xfe   : > { %v499_v62 = vadd.f32 %v498_v61, %v351_v59  ;;  %v500_v63 = vpop.f32.mrb[11].mxu0  ;;  %836 = vmatpush1.bf16.msra.mxu1 %v835_v54 }
  0xff   : > { %v501_v1 = vadd.f32 %v500_v63, %v351_v59 }
 0x100   : > { %v525_v3 = vmax.f32 %v499_v62, 0.0 }
 0x101   : > { %v526_v6 = vmax.f32 %v501_v1, 0.0  ;;  %v504_v7 = vpop.f32.mrb[12].mxu0 }
 0x102   : > { %v839_v8 = vpack.c.bf16 %v525_v3, %v523_v2  ;;  %v506_v9 = vpop.f32.mrb[13].mxu0  ;;  %v505_v12 = vadd.f32 %v504_v7, %v356_v10 }
 0x103   : > { %v837_v11 = vpack.c.bf16 %v526_v6, %v524_v4  ;;  %v507_v14 = vadd.f32 %v506_v9, %v356_v10 }
 0x104   : > { %v527_v19 = vmax.f32 %v505_v12, 0.0 }
 0x105   : > { %v510_v15 = vpop.f32.mrb[14].mxu0  ;;  %838 = vmatprep.subr.bf16.mxu1 %v837_v11  ;;  %v528_v21 = vmax.f32 %v507_v14, 0.0 }
 0x106   : > { %v511_v16 = vadd.f32 %v510_v15, %v361_v13  ;;  %v512_v17 = vpop.f32.mrb[15].mxu0  ;;  %840 = vmatpush1.bf16.msra.mxu1 %v839_v8 }
 0x107   : > { %v513_v18 = vadd.f32 %v512_v17, %v361_v13 }
 0x108   : > { %v529_v20 = vmax.f32 %v511_v16, 0.0 }
 0x109   : > { %v530_v22 = vmax.f32 %v513_v18, 0.0 }
 0x10a   : > { %v843_v23 = vpack.c.bf16 %v529_v20, %v527_v19 }
 0x10b   : > { %v841_v24 = vpack.c.bf16 %v530_v22, %v528_v21 }
 0x10d   : > { %842 = vmatprep.subr.bf16.mxu1 %v841_v24 }
 0x10e   : > { %844 = vmatpush1.bf16.msra.mxu1 %v843_v23 }
 0x111   : > { %823 = vmatmul.mubr.msk.f32.vlgmr.msra.gmra.mrb[0].mxu1 %vm538_vm3, %v531_v25 }
 0x1e4   : > { %v608_v34 = vpop.f32.mrb[0].mxu1 }
 0x1e5   : > { %v609_v35 = vadd.f32 %v608_v34, %v536_v33  ;;  %v610_v36 = vpop.f32.mrb[1].mxu1 }
 0x1e6   : > { %v611_v37 = vadd.f32 %v610_v36, %v536_v33 }
 0x1e7   : > { %v626_v40 = vsub.f32 0.0, %v609_v35 }
 0x1e8   : > { %v615_v41 = vcombine.low %v609_v35, %v611_v37  ;;  %v627_v42 = vsub.f32 0.0, %v611_v37  ;;  %v655_v43 = vcombine.high %v609_v35, %v611_v37 }
 0x1e9   : > { %v628_v44 = vmul.f32 1.442695, %v626_v40 }
 0x1ea   : > { %v622_v45 = vrot.slane %v615_v41, %v621_v38  ;;  %v630_v46 = vmul.f32 1.442695, %v627_v42  ;;  %v662_v0 = vrot.slane %v655_v43, %v661_v39 }
 0x1eb   : > { %875 = vpow2.f32 %v628_v44 }
 0x1ec   : > { %v623_v49 = vcombine.high %v622_v45, %v622_v45  ;;  %877 = vpow2.f32 %v630_v46  ;;  %v669_v50 = vrot.slane %v662_v0, %v661_v39 }
 0x1ee   : > { %v625_v51 = vsub.f32 %v811_v47, %v623_v49  ;;  %v671_v52 = vadd.f32 %v669_v50, %v654_v48 }
 0x1f0   : > { %676 = vst.msk [vmem:[%s991_s16] sm:$0x3] %vm971_vm0, %v671_v52 }
 0x1f5   : > { %v876_v53 = vpop.eup %875 }
 0x1f6   : > { %v878_v54 = vpop.eup %877 }
 0x1f7   : > { %v634_v55 = vcombine.low %v876_v53, %v878_v54 }
 0x1f9   : > { %v641_v56 = vrot.slane %v634_v55, %v621_v38 }
 0x1fb   : > { %v643_v57 = vmul.f32 %v641_v56, %v625_v51 }
 0x1fd   : > { %824 = vst [vmem:[%s745_s12 + $0x4] sm:$0xf] %v643_v57 }
 0x1fe PF: > { %s17_s23 = sadd.s32 1, %s901_s23   ;;  %s1076_s21 = smov %s897_s22 }
 0x1ff   : > { %p14_p5 = scmp.ge.s32.totalorder %s17_s23, 4   ;;  %s1077_s22 = smov %s1079_s24 }
 0x201   :  { %16 = sbr.rel (!%p14_p5) target bundleno = 2 (0x2), region = 87 }

</bundles_post_ra>
